<compile_context>
chip_gen: v6e
topology: v6e:2x2x1
jax: 0.10.0
libtpu: 0.0.40
codegen_flags: <defaults>
</compile_context>

<pallas_src>
import jax
import jax.numpy as jnp
from jax import lax
from jax.experimental import pallas as pl
from jax.experimental.pallas import tpu as pltpu

EPS = 1e-5
NEG_SLOPE = 0.2
LANE = 128  # Cout tile width (lane-dense stores)


def _make_down_kernel(normalize: bool):
    def kernel(p_ref, w_ref, o_ref):
        # p_ref : (1, HW, K)    bf16   im2col patches for one batch element
        # w_ref : (K, LANE)     bf16   conv-weight tile (zero-padded channels)
        # o_ref : (1, HW, LANE) f32
        p = p_ref[0]                     # (HW, K)
        w = w_ref[...]                   # (K, LANE)

        # 4x4 / stride-2 conv == one MXU matmul over K = 16*Cin, f32 accumulation.
        y = jnp.dot(p, w, preferred_element_type=jnp.float32)   # (HW, LANE) f32

        if normalize:
            # InstanceNorm2d (affine=False, biased variance), single pass.
            hw = y.shape[0]
            inv_hw = jnp.float32(1.0 / hw)
            s = jnp.sum(y, axis=0, keepdims=True)                # (1, LANE)
            ss = jnp.sum(y * y, axis=0, keepdims=True)           # (1, LANE)
            mean = s * inv_hw
            var = jnp.maximum(ss * inv_hw - mean * mean, 0.0)
            y = (y - mean) * lax.rsqrt(var + EPS)

        # LeakyReLU(0.2)
        o_ref[0] = jnp.where(y >= 0.0, y, NEG_SLOPE * y).astype(o_ref.dtype)

    return kernel


def unet_down_forward(x, conv_weight, *, normalize=True):
    """Pallas implementation of UNetDown.forward (dropout=0.0).

    x           : (N, Cin, H, W)      float32 (NCHW, like PyTorch)
    conv_weight : (Cout, Cin, 4, 4)   float32 (PyTorch Conv2d weight layout)
    returns     : (N, Cout, H//2, W//2)
    """
    N, Cin, H, W = x.shape
    Cout, Cin_w, KH, KW = conv_weight.shape
    assert (Cin_w, KH, KW) == (Cin, 4, 4), "expects a 4x4 conv weight"

    Ho = (H + 2 - 4) // 2 + 1
    Wo = (W + 2 - 4) // 2 + 1
    HW = Ho * Wo
    K = 16 * Cin
    Cpad = ((Cout + LANE - 1) // LANE) * LANE

    # ---- glue: NCHW -> NHWC, pad by 1, im2col (stride-2 4x4 windows) ----------
    x_nhwc = jnp.transpose(x, (0, 2, 3, 1))                       # (N, H, W, Cin)
    xp = jnp.pad(x_nhwc, ((0, 0), (1, 1), (1, 1), (0, 0)))        # (N, H+2, W+2, Cin)

    slabs = []
    for kh in range(4):
        for kw in range(4):
            slabs.append(lax.slice(
                xp,
                (0, kh, kw, 0),
                (N, kh + 2 * Ho - 1, kw + 2 * Wo - 1, Cin),
                (1, 2, 2, 1)))                                    # (N, Ho, Wo, Cin)
    # K ordering = (kh, kw, ci), matching the weight reshape below.
    patches = jnp.stack(slabs, axis=3).reshape(N, HW, K).astype(jnp.bfloat16)

    # (Cout, Cin, 4, 4) -> (4, 4, Cin, Cout) -> (K, Cout), zero-pad Cout to 128-mult.
    w_mat = jnp.transpose(conv_weight, (2, 3, 1, 0)).reshape(K, Cout)
    w_mat = jnp.pad(w_mat, ((0, 0), (0, Cpad - Cout))).astype(jnp.bfloat16)

    # ---- fused conv + InstanceNorm + LeakyReLU kernel -------------------------
    y = pl.pallas_call(
        _make_down_kernel(normalize),
        out_shape=jax.ShapeDtypeStruct((N, HW, Cpad), jnp.float32),
        grid_spec=pltpu.PrefetchScalarGridSpec(
            num_scalar_prefetch=0,
            grid=(N, Cpad // LANE),
            in_specs=[
                pl.BlockSpec((1, HW, K), lambda n, j: (n, 0, 0)),
                pl.BlockSpec((K, LANE), lambda n, j: (0, j)),
            ],
            out_specs=pl.BlockSpec((1, HW, LANE), lambda n, j: (n, 0, j)),
        ),
        compiler_params=pltpu.CompilerParams(
            dimension_semantics=("parallel", "parallel")),
    )(patches, w_mat)

    # ---- glue: drop channel padding, back to NCHW ------------------------------
    y = y.reshape(N, Ho, Wo, Cpad)[:, :, :, :Cout]
    return jnp.transpose(y, (0, 3, 1, 2))


if __name__ == "__main__":
    # Small deterministic example consistent with the module.
    N, Cin, Cout, H, W = 2, 4, 8, 16, 16

    key = jax.random.PRNGKey(0)
    kx, kw = jax.random.split(key)
    x = jax.random.normal(kx, (N, Cin, H, W), dtype=jnp.float32)
    conv_w = jax.random.normal(kw, (Cout, Cin, 4, 4), dtype=jnp.float32) * 0.1

    out = unet_down_forward(x, conv_w)
    out = jax.block_until_ready(out)

    assert out.shape == (N, Cout, H // 2, W // 2), out.shape
    assert bool(jnp.all(jnp.isfinite(out)))

    # Reference check (inputs rounded to bf16 so the only delta vs. the kernel is
    # f32 accumulation order).
    xb = x.astype(jnp.bfloat16).astype(jnp.float32)
    wb = conv_w.astype(jnp.bfloat16).astype(jnp.float32)
    ref = lax.conv_general_dilated(
        xb, wb, (2, 2), ((1, 1), (1, 1)),
        dimension_numbers=("NCHW", "OIHW", "NCHW"))
    m = jnp.mean(ref, axis=(2, 3), keepdims=True)
    v = jnp.var(ref, axis=(2, 3), keepdims=True)          # biased variance
    refn = (ref - m) * lax.rsqrt(v + EPS)
    ref_out = jnp.where(refn >= 0.0, refn, NEG_SLOPE * refn)
    assert jnp.allclose(out, ref_out, atol=5e-2, rtol=5e-2), \
        float(jnp.max(jnp.abs(out - ref_out)))

    print("KERNEL_OK")
</pallas_src>

<mosaic_0001>
module attributes {stable_mosaic.version = 11 : i64} {
  func.func @kernel(%arg0: i32, %arg1: i32, %arg2: memref<1x64x64xbf16, #tpu.memory_space<vmem>>, %arg3: memref<64x128xbf16, #tpu.memory_space<vmem>>, %arg4: memref<1x64x128xf32, #tpu.memory_space<vmem>>) attributes {dimension_semantics = [#tpu.dimension_semantics<parallel>, #tpu.dimension_semantics<parallel>], iteration_bounds = array<i64: 2, 1>, scalar_prefetch = 0 : i64, scratch_operands = 0 : i64, tpu.core_type = #tpu.core_type<tc>, window_params = [{transform_indices = @transform_0, window_bounds = array<i64: 1, 64, 64>}, {transform_indices = @transform_1, window_bounds = array<i64: 64, 128>}, {transform_indices = @transform_2, window_bounds = array<i64: 1, 64, 128>}]} {
    %c0 = arith.constant 0 : index
    %c0_0 = arith.constant 0 : index
    %c0_1 = arith.constant 0 : index
    %0 = vector.load %arg2[%c0, %c0_0, %c0_1] : memref<1x64x64xbf16, #tpu.memory_space<vmem>>, vector<1x64x64xbf16>
    %1 = vector.shape_cast %0 : vector<1x64x64xbf16> to vector<64x64xbf16>
    %c0_2 = arith.constant 0 : index
    %c0_3 = arith.constant 0 : index
    %2 = vector.load %arg3[%c0_2, %c0_3] : memref<64x128xbf16, #tpu.memory_space<vmem>>, vector<64x128xbf16>
    %cst = arith.constant dense<0.000000e+00> : vector<64x128xf32>
    %3 = tpu.matmul %1, %2, %cst {dimension_numbers = #tpu.dot_dimension_numbers<[1], [0], [0], [1], [0, 0, 1, 1], [], []>} : vector<64x64xbf16>, vector<64x128xbf16>, vector<64x128xf32> -> vector<64x128xf32>
    %cst_4 = arith.constant dense<0.000000e+00> : vector<128xf32>
    %4 = vector.multi_reduction <add>, %3, %cst_4 [0] : vector<64x128xf32> to vector<128xf32>
    %5 = vector.shape_cast %4 : vector<128xf32> to vector<1x128xf32>
    %6 = arith.mulf %3, %3 : vector<64x128xf32>
    %cst_5 = arith.constant dense<0.000000e+00> : vector<128xf32>
    %7 = vector.multi_reduction <add>, %6, %cst_5 [0] : vector<64x128xf32> to vector<128xf32>
    %8 = vector.shape_cast %7 : vector<128xf32> to vector<1x128xf32>
    %cst_6 = arith.constant 1.562500e-02 : f32
    %9 = vector.broadcast %cst_6 : f32 to vector<1x128xf32>
    %10 = arith.mulf %5, %9 : vector<1x128xf32>
    %cst_7 = arith.constant 1.562500e-02 : f32
    %11 = vector.broadcast %cst_7 : f32 to vector<1x128xf32>
    %12 = arith.mulf %8, %11 : vector<1x128xf32>
    %13 = arith.mulf %10, %10 : vector<1x128xf32>
    %14 = arith.subf %12, %13 : vector<1x128xf32>
    %cst_8 = arith.constant 0.000000e+00 : f32
    %15 = vector.broadcast %cst_8 : f32 to vector<1x128xf32>
    %16 = arith.maximumf %14, %15 : vector<1x128xf32>
    %17 = vector.broadcast %10 : vector<1x128xf32> to vector<64x128xf32>
    %18 = arith.subf %3, %17 : vector<64x128xf32>
    %cst_9 = arith.constant 9.99999974E-6 : f32
    %19 = vector.broadcast %cst_9 : f32 to vector<1x128xf32>
    %20 = arith.addf %16, %19 : vector<1x128xf32>
    %21 = math.rsqrt %20 : vector<1x128xf32>
    %22 = vector.broadcast %21 : vector<1x128xf32> to vector<64x128xf32>
    %23 = arith.mulf %18, %22 : vector<64x128xf32>
    %cst_10 = arith.constant 0.000000e+00 : f32
    %24 = vector.broadcast %cst_10 : f32 to vector<64x128xf32>
    %25 = arith.cmpf oge, %23, %24 : vector<64x128xf32>
    %cst_11 = arith.constant 2.000000e-01 : f32
    %26 = vector.broadcast %cst_11 : f32 to vector<64x128xf32>
    %27 = arith.mulf %26, %23 : vector<64x128xf32>
    %28 = arith.select %25, %23, %27 : vector<64x128xi1>, vector<64x128xf32>
    %c0_12 = arith.constant 0 : index
    %c0_13 = arith.constant 0 : index
    %c0_14 = arith.constant 0 : index
    %29 = vector.load %arg4[%c0_12, %c0_13, %c0_14] : memref<1x64x128xf32, #tpu.memory_space<vmem>>, vector<1x64x128xf32>
    %30 = vector.shape_cast %29 : vector<1x64x128xf32> to vector<64x128xf32>
    %31 = vector.shape_cast %28 : vector<64x128xf32> to vector<1x64x128xf32>
    tpu.vector_store %arg4[%c0_12, %c0_13, %c0_14], %31 {strides = array<i32>} : memref<1x64x128xf32, #tpu.memory_space<vmem>>, vector<1x64x128xf32>,
    return
  }
  func.func @transform_0(%arg0: i32, %arg1: i32) -> (i32, i32, i32) {
    %c0_i32 = arith.constant 0 : i32
    %c0_i32_0 = arith.constant 0 : i32
    %c0_i32_1 = arith.constant 0 : i32
    return %arg0, %c0_i32, %c0_i32_0 : i32, i32, i32
  }
  func.func @transform_1(%arg0: i32, %arg1: i32) -> (i32, i32) {
    %c0_i32 = arith.constant 0 : i32
    %c0_i32_0 = arith.constant 0 : i32
    return %c0_i32, %arg1 : i32, i32
  }
  func.func @transform_2(%arg0: i32, %arg1: i32) -> (i32, i32, i32) {
    %c0_i32 = arith.constant 0 : i32
    %c0_i32_0 = arith.constant 0 : i32
    return %arg0, %c0_i32, %arg1 : i32, i32, i32
  }
}

</mosaic_0001>

<bundles_post_ra>
// kernel: tpu_custom_call.1
= control target key start
LH: loop header
LB: loop body
LE: loop exit
PB: predicated region body
PF: predicated region fallthrough
CT: control target
= control target key end

     0   :  { %7 = vsyncpa [#allocation3], 0  ;;  %s1064_s0 = inlined_call_operand.hbm [shape: bf16[2,64,64], index: 0, kind: input, shape index: {}]   ;;  %s1065_s1 = inlined_call_operand.hbm [shape: bf16[64,128], index: 1, kind: input, shape index: {}]   ;;  %s1066_s2 = inlined_call_operand.hbm [shape: f32[2,64,128], index: 2, kind: output, shape index: {}]  }
   0x1   :  { %9 = vsyncpa [#allocation3 + $0x1], 0 }
   0x2   :  { %10 = vsyncpa [#allocation6], 0 }
   0x3   :  { %11 = vsyncpa [#allocation4], 0 }
   0x4   :  { %13 = vsyncpa [#allocation4 + $0x1], 0  ;;  %s848_s9 = smov 0   ;;  %s850_s10 = smov 0  }
   0x5   :  { %s852_s11 = smov 0   ;;  %s854_s12 = smov 0  }
   0x6   :  { %s856_s13 = smov 0   ;;  %s858_s14 = smov 0  }
   0x7 LB: > { %s536_s15 = sadd.s32 4294967295, %s824_s14   ;;  %s537_s16 = sadd.s32 4294967294, %s824_s14   ;;  %s824_s14 = sphi %s858_s14, %s19_s14   ;;  %s820_s13 = sphi %s856_s13, %s1086_s13   ;;  %s816_s12 = sphi %s854_s12, %s1085_s12   ;;  %s812_s11 = sphi %s852_s11, %s1084_s11   ;;  %s808_s10 = sphi %s850_s10, %s1083_s10   ;;  %s804_s9 = sphi %s848_s9, %s1082_s9  }
   0x8   : > { %p51_p0 = scmp.ne.s32.totalorder %s808_s10, %s804_s9  ;;  %p882_p1 = scmp.eq.s32.totalorder %s536_s15, 0 }
   0x9   : > { %p886_p2 = scmp.eq.s32.totalorder %s536_s15, 1  ;;  %p109_p3 = scmp.eq.s32.totalorder %s537_s16, 1 }
   0xa   : > { %p892_p4 = por %p882_p1, %p51_p0  ;;  %p538_p5 = scmp.ge.s32.totalorder %s824_s14, 1 }
   0xb   : > { %p897_p6 = por %p109_p3, %p51_p0  ;;  %p116_p7 = scmp.lt.s32.totalorder %s824_s14, 3 }
   0xc   : > { %s1071_s19 = scalar_select %p892_p4, 1, 0 }
   0xd   : > { %s1072_s20 = scalar_select %p897_p6, 1, 0 }
   0xe   : > { %p902_p8 = pnand %p538_p5, %p116_p7  ;;  %s826_s22 = smov [#allocation5]  }
   0xf   : > { %s130_s23 = sshll.u32 %s826_s22, 4  ;;  %s31_s25 = sadd.s32 1, %s820_s13  ;;  %s131_s23 = int_to_ptr.vmem [resolvable:$true] %s130_s23 }
  0x10   : > { %p607_p9 = pneg %p902_p8  ;;  %s697_s26 = scalar_lea.vmem %s131_s23, 512 }
  0x11   : > { %p698_p13 = scmp.ne.s32.totalorder %s131_s23, %s697_s26  ;;  %p705_p5 = scmp.lt.s32.totalorder %s131_s23, %s131_s23 }
  0x12   : > { %p911_p11 = pnand %p607_p9, %p882_p1  ;;  %p706_p7 = scmp.lt.s32.totalorder %s697_s26, %s697_s26 }
  0x14   : > { %p688_p12 = pneg %p911_p11  ;;  %p707_p6 = por %p706_p7, %p705_p5 }
  0x16   : > { %p700_p0 = pnand %p698_p13, %p688_p12 }
  0x18   : > { %p701_p3 = pneg %p700_p0 }
  0x1a   : > { %p708_p4 = pnand %p707_p6, %p701_p3 }
  0x1c   : > { %711 = shalt.err (!%p708_p4)
}
  0x1d   : > { %s1068_s27 = smov 64   ;;  %s828_s28 = smov 4  }
  0x1e   : > { %610 = dma.hbm_to_vmem [thread:$0]  (!%p911_p11), %s1065_s1, 512, %s131_s23, [#allocation6], %s1068_s27, %s1068_s27, %s828_s28  }
  0x1f   : > { %p33_p4 = scmp.ge.s32.totalorder %s31_s25, 2  ;;  %s38_s3 = sadd.s32 1, %s812_s11 }
  0x20   : > { %p45_p6 = scmp.ne.s32.totalorder %s812_s11, %s808_s10  ;;  %p46_p9 = scmp.eq.s32.totalorder %s824_s14, 0 }
  0x21   : > { %s1088_s25 = smov (%p33_p4, %s31_s25), 0  ;;  %p620_p0 = scmp.lt.s32.totalorder %s824_s14, 2 }
  0x22   : > { %p932_p12 = por %p46_p9, %p45_p6  ;;  %p938_p13 = por %p886_p2, %p45_p6 }
  0x23   : > { %s35_s6 = ssub.s32 %s820_s13, %s1088_s25  ;;  %s144_s7 = sand.u32 1, %s812_s11  }
  0x24   : > { %p36_p11 = scmp.eq.s32.totalorder %s35_s6, 0  ;;  %s541_s8 = sshll.u32 %s144_s7, 5 }
  0x25   : > { %s565_s16 = sshll.u32 %s820_s13, 9  ;;  %s148_s26 = scalar_lea.vmem [#allocation2], %s541_s8 }
  0x26   : > { %s947_s15 = scalar_select %p36_p11, %s812_s11, %s38_s3  }
  0x27   : > { %s154_s24 = scalar_lea.hbm %s1064_s0, %s565_s16  ;;  %s155_s29 = sshll.u32 %s148_s26, 4  ;;  %s156_s29 = int_to_ptr.vmem [resolvable:$true] %s155_s29 }
  0x28   : > { %p955_p2 = pnand %p620_p0, %p932_p12  ;;  %s145_s30 = scalar_lea.sflag [#allocation3], %s144_s7 }
  0x29   : > { %s725_s6 = scalar_lea.vmem %s156_s29, 512  ;;  %s829_s3 = smov [#allocation2]  }
  0x2a   : > { %p714_p3 = pneg %p955_p2  ;;  %p726_p5 = scmp.ne.s32.totalorder %s156_s29, %s725_s6 }
  0x2b   : > { %s730_s27 = sshll.u32 %s829_s3, 4  ;;  %s731_s27 = int_to_ptr.vmem [resolvable:$false] %s730_s27 }
  0x2c   : > { %p728_p7 = pnand %p726_p5, %p714_p3  ;;  %s732_s16 = scalar_lea.vmem %s731_s27, 1024 }
  0x2d   : > { %p733_p6 = scmp.lt.s32.totalorder %s156_s29, %s731_s27  ;;  %p734_p9 = scmp.lt.s32.totalorder %s732_s16, %s725_s6 }
  0x2e   : > { %p729_p4 = pneg %p728_p7 }
  0x2f   : > { %p735_p11 = por %p734_p9, %p733_p6 }
  0x31   : > { %p736_p10 = pnand %p735_p11, %p729_p4 }
  0x33   : > { %739 = shalt.err (!%p736_p10)
}
  0x34   : > { %s1078_s4 = smov 64   ;;  %167 = sbr.rel (%p902_p8) target bundleno = 350 (0x15e), region = 28 }
  0x35   : > { %614 = dma.hbm_to_vmem [thread:$0]  (!%p955_p2), %s154_s24, 512, %s156_s29, %s145_s30, %s1078_s4, %s1078_s4, %s828_s28  }
  0x36   : > { %s969_s7 = sand.u32 (!%p902_p8), 1, %s808_s10   ;;  %p1079_p12 = scmp.ne.s32.totalorder (!%p902_p8), %s1071_s19, 0 }
  0x37   : > { %s545_s27 = sshll.u32 (!%p902_p8), %s969_s7, 5  ;;  %s170_s8 = scalar_lea.sflag (!%p902_p8), [#allocation3], %s969_s7 }
  0x38   : > { %s173_s22 = scalar_lea.vmem (!%p902_p8), [#allocation2], %s545_s27 }
  0x39   : > { %791 = dma.done.wait (%p1079_p12), %s170_s8, 512  }
  0x3a   : > { %793 = vsyncadd (%p1079_p12), %s170_s8, 4294966784 }
  0x3b   : > { %795 = dma.done.wait (%p882_p1), [#allocation6], 512  }
  0x3c   : > { %797 = vsyncadd (%p882_p1), [#allocation6], 4294966784  ;;  %v676_v0 = vld [vmem:[#allocation5 + $0x18] sm:$0xff]   ;;  %v677_v1 = vld [vmem:[#allocation5 + $0x10] sm:$0xff]   ;;  %vm259_vm0 = vcmask 523264   ;;  %s547_s17 = sshll.u32 %s969_s7, 6 }
  0x3d   : > { %575 = vmatprep.subr.bf16.mxu0 %v676_v0  ;;  %591 = vmatprep.subr.bf16.mxu1 %v676_v0  ;;  %v678_v2 = vld [vmem:[#allocation5 + $0x8] sm:$0xff]   ;;  %v680_v3 = vld [vmem:[%s173_s22] sm:$0xff]   ;;  %v682_v4 = vld [vmem:[%s173_s22 + $0x10] sm:$0xff]   ;;  %s566_s19 = sshll.u32 %s816_s12, 10  ;;  %s993_s21 = scalar_lea.vmem [#allocation7], %s547_s17 }
  0x3e   : > { %576 = vmatpush3.bf16.msra.mxu0 %v676_v0  ;;  %595 = vmatpush3.bf16.msra.mxu1 %v676_v0  ;;  %v679_v5 = vld [vmem:[#allocation5] sm:$0xff]   ;;  %v681_v6 = vld [vmem:[%s173_s22 + $0x8] sm:$0xff]   ;;  %v683_v7 = vld [vmem:[%s173_s22 + $0x18] sm:$0xff]   ;;  %s441_s28 = sshll.u32 %s993_s21, 4  ;;  %s1002_s24 = scalar_lea.hbm %s1066_s2, %s566_s19  ;;  %s1004_s28 = int_to_ptr.vmem [resolvable:$true] %s441_s28 }
  0x3f   : > { %577 = vmatprep.subr.bf16.mxu0 %v677_v1  ;;  %592 = vmatprep.subr.bf16.mxu1 %v677_v1  ;;  %s427_s26 = scalar_lea.sflag [#allocation4], %s969_s7  ;;  %s740_s29 = scalar_lea.vmem %s1004_s28, 1024 }
  0x40   : > { %583 = vmatprep.mubr.msk.bf16.mxu0 %vm259_vm0, %v680_v3  ;;  %587 = vmatprep.mubr.msk.bf16.mxu1 %vm259_vm0, %v682_v4  ;;  %p741_p1 = scmp.ne.s32.totalorder %s1004_s28, %s740_s29  ;;  %s830_s18 = smov [#allocation7]  }
  0x41   : > { %s744_s30 = sshll.u32 %s830_s18, 4  ;;  %s745_s30 = int_to_ptr.vmem [resolvable:$false] %s744_s30 }
  0x42   : > { %578 = vmatpush3.bf16.msra.mxu0 %v677_v1  ;;  %596 = vmatpush3.bf16.msra.mxu1 %v677_v1  ;;  %p742_p8 = pnand %p741_p1, %p938_p13  ;;  %s746_s6 = scalar_lea.vmem %s745_s30, 2048 }
  0x43   : > { %579 = vmatprep.subr.bf16.mxu0 %v678_v2  ;;  %593 = vmatprep.subr.bf16.mxu1 %v678_v2  ;;  %p747_p0 = scmp.lt.s32.totalorder %s1004_s28, %s745_s30  ;;  %p748_p2 = scmp.lt.s32.totalorder %s746_s6, %s740_s29 }
  0x44   : > { %p743_p10 = pneg %p742_p8 }
  0x45   : > { %p749_p3 = por %p748_p2, %p747_p0 }
  0x46   : > { %580 = vmatpush3.bf16.msra.mxu0 %v678_v2  ;;  %597 = vmatpush3.bf16.msra.mxu1 %v678_v2 }
  0x47   : > { %581 = vmatprep.subr.bf16.mxu0 %v679_v5  ;;  %594 = vmatprep.subr.bf16.mxu1 %v679_v5  ;;  %p750_p5 = pnand %p749_p3, %p743_p10 }
  0x4a   : > { %582 = vmatpush3.bf16.msra.mxu0 %v679_v5  ;;  %598 = vmatpush3.bf16.msra.mxu1 %v679_v5 }
  0x4d   : > { %584 = vmatmul.mubr.msk.bf16.vlgmr.msra.gmra.mxu0 %vm259_vm0, %v681_v6  ;;  %588 = vmatmul.mubr.msk.bf16.vlgmr.msra.gmra.mxu1 %vm259_vm0, %v683_v7 }
 0x10d   : > { %v585_v8 = vpop.f32.mrf.mxu0  ;;  %v985_v9 = vpop.f32.mrf.mxu1 }
 0x10e   : > { %v352_v18 = vmul.f32 %v585_v8, %v585_v8  ;;  %v356_v31 = vmul.f32 %v985_v9, %v985_v9 }
 0x10f   : > { %v306_v10 = vpop.f32.mrf.mxu0  ;;  %v322_v12 = vpop.f32.mrf.mxu1 }
 0x110   : > { %v350_v14 = vmul.f32 %v306_v10, %v306_v10  ;;  %v354_v25 = vmul.f32 %v322_v12, %v322_v12 }
 0x111   : > { %v586_v11 = vpop.f32.mrf.mxu0  ;;  %v590_v17 = vpop.f32.mrf.mxu1 }
 0x112   : > { %v353_v21 = vmul.f32 %v586_v11, %v586_v11  ;;  %v357_v34 = vmul.f32 %v590_v17, %v590_v17 }
 0x113   : > { %v309_v13 = vpop.f32.mrf.mxu0  ;;  %v325_v24 = vpop.f32.mrf.mxu1 }
 0x114   : > { %v337_v15 = vadd.f32 %v309_v13, %v306_v10  ;;  %v351_v16 = vmul.f32 %v309_v13, %v309_v13  ;;  %v355_v29 = vmul.f32 %v325_v24, %v325_v24 }
 0x116   : > { %v338_v19 = vadd.f32 %v585_v8, %v337_v15  ;;  %v358_v20 = vadd.f32 %v351_v16, %v350_v14 }
 0x118   : > { %v359_v22 = vadd.f32 %v358_v20, %v352_v18  ;;  %v339_v23 = vadd.f32 %v586_v11, %v338_v19 }
 0x11a   : > { %v340_v26 = vadd.f32 %v339_v23, %v322_v12  ;;  %v360_v27 = vadd.f32 %v359_v22, %v353_v21 }
 0x11c   : > { %v341_v28 = vadd.f32 %v340_v26, %v325_v24  ;;  %v361_v30 = vadd.f32 %v360_v27, %v354_v25 }
 0x11e   : > { %v342_v32 = vadd.f32 %v985_v9, %v341_v28  ;;  %v362_v33 = vadd.f32 %v361_v30, %v355_v29 }
 0x120   : > { %v343_v35 = vadd.f32 %v590_v17, %v342_v32  ;;  %v363_v36 = vadd.f32 %v362_v33, %v356_v31 }
 0x122   : > { %v344_v37 = vrot.slane %v343_v35, 4  ;;  %v364_v38 = vadd.f32 %v363_v36, %v357_v34 }
 0x124   : > { %v345_v39 = vadd.f32 %v344_v37, %v343_v35  ;;  %v365_v40 = vrot.slane %v364_v38, 4 }
 0x126   : > { %v346_v41 = vrot.slane %v345_v39, 2  ;;  %v366_v42 = vadd.f32 %v365_v40, %v364_v38 }
 0x128   : > { %v347_v43 = vadd.f32 %v346_v41, %v345_v39  ;;  %v367_v44 = vrot.slane %v366_v42, 2 }
 0x12a   : > { %v348_v45 = vrot.slane %v347_v43, 1  ;;  %v368_v46 = vadd.f32 %v367_v44, %v366_v42 }
 0x12c   : > { %v349_v47 = vadd.f32 %v348_v45, %v347_v43  ;;  %v369_v48 = vrot.slane %v368_v46, 1 }
 0x12e   : > { %v370_v49 = vadd.f32 %v369_v48, %v368_v46  ;;  %v371_v50 = vmul.f32 0.015625, %v349_v47 }
 0x130   : > { %v372_v51 = vmul.f32 0.015625, %v370_v49  ;;  %v373_v52 = vmul.f32 %v371_v50, %v371_v50  ;;  %v376_v56 = vsub.f32 %v306_v10, %v371_v50  ;;  %v377_v57 = vsub.f32 %v309_v13, %v371_v50 }
 0x131   : > { %v378_v58 = vsub.f32 %v585_v8, %v371_v50  ;;  %v379_v59 = vsub.f32 %v586_v11, %v371_v50  ;;  %v380_v61 = vsub.f32 %v322_v12, %v371_v50  ;;  %v381_v62 = vsub.f32 %v325_v24, %v371_v50 }
 0x132   : > { %v374_v53 = vsub.f32 %v372_v51, %v373_v52  ;;  %v382_v63 = vsub.f32 %v985_v9, %v371_v50  ;;  %v383_v0 = vsub.f32 %v590_v17, %v371_v50 }
 0x134   : > { %v375_v54 = vmax.f32 %v374_v53, 0.0 }
 0x136   : > { %v384_v55 = vadd.f32 1e-05, %v375_v54 }
 0x138   : > { %684 = vrsqrt.f32 %v384_v55 }
 0x145   : > { %v685_v60 = vpop.eup %684 }
 0x146   : > { %v386_v1 = vmul.f32 %v685_v60, %v376_v56  ;;  %v387_v2 = vmul.f32 %v685_v60, %v377_v57  ;;  %v388_v3 = vmul.f32 %v685_v60, %v378_v58  ;;  %v389_v4 = vmul.f32 %v685_v60, %v379_v59 }
 0x147   : > { %v390_v5 = vmul.f32 %v685_v60, %v380_v61  ;;  %v391_v6 = vmul.f32 %v685_v60, %v381_v62  ;;  %v392_v7 = vmul.f32 %v685_v60, %v382_v63  ;;  %v393_v14 = vmul.f32 %v685_v60, %v383_v0 }
 0x148   : > { %vm394_vm1 = vcmp.ge.f32.partialorder %v386_v1, 0.0  ;;  %vm395_vm2 = vcmp.ge.f32.partialorder %v387_v2, 0.0  ;;  %vm396_vm3 = vcmp.ge.f32.partialorder %v388_v3, 0.0  ;;  %vm397_vm5 = vcmp.ge.f32.partialorder %v389_v4, 0.0 }
 0x149   : > { %vm399_vm4 = vcmp.ge.f32.partialorder %v391_v6, 0.0  ;;  %v407_v8 = vmul.f32 0.2, %v391_v6  ;;  %vm398_vm6 = vcmp.ge.f32.partialorder %v390_v5, 0.0  ;;  %vm400_vm7 = vcmp.ge.f32.partialorder %v392_v7, 0.0 }
 0x14a   : > { %vm401_vm8 = vcmp.ge.f32.partialorder %v393_v14, 0.0  ;;  %v402_v9 = vmul.f32 0.2, %v386_v1  ;;  %v403_v10 = vmul.f32 0.2, %v387_v2 }
 0x14b   : > { %v415_v11 = vsel %vm399_vm4, %v391_v6, %v407_v8  ;;  %v404_v12 = vmul.f32 0.2, %v388_v3  ;;  %v405_v13 = vmul.f32 0.2, %v389_v4  ;;  %v406_v15 = vmul.f32 0.2, %v390_v5 }
 0x14c   : > { %423 = vst [vmem:[%s993_s21 + $0x28] sm:$0xff] %v415_v11  ;;  %v408_v16 = vmul.f32 0.2, %v392_v7  ;;  %v409_v17 = vmul.f32 0.2, %v393_v14  ;;  %v410_v18 = vsel %vm394_vm1, %v386_v1, %v402_v9  ;;  %v411_v19 = vsel %vm395_vm2, %v387_v2, %v403_v10 }
 0x14d   : > { %v412_v20 = vsel %vm396_vm3, %v388_v3, %v404_v12  ;;  %v413_v21 = vsel %vm397_vm5, %v389_v4, %v405_v13  ;;  %v414_v22 = vsel %vm398_vm6, %v390_v5, %v406_v15  ;;  %418 = vst [vmem:[%s993_s21] sm:$0xff] %v410_v18  ;;  %419 = vst [vmem:[%s993_s21 + $0x8] sm:$0xff] %v411_v19 }
 0x14e   : > { %v416_v23 = vsel %vm400_vm7, %v392_v7, %v408_v16  ;;  %v417_v24 = vsel %vm401_vm8, %v393_v14, %v409_v17  ;;  %420 = vst [vmem:[%s993_s21 + $0x10] sm:$0xff] %v412_v20  ;;  %421 = vst [vmem:[%s993_s21 + $0x18] sm:$0xff] %v413_v21 }
 0x14f   : > { %422 = vst [vmem:[%s993_s21 + $0x20] sm:$0xff] %v414_v22  ;;  %424 = vst [vmem:[%s993_s21 + $0x30] sm:$0xff] %v416_v23 }
 0x150   : > { %425 = vst [vmem:[%s993_s21 + $0x38] sm:$0xff] %v417_v24 }
 0x151   : > { %753 = shalt.err (!%p750_p5)
}
 0x152   : > { %s754_s3 = scalar_lea.hbm %s1002_s24, 1024  ;;  %s758_s27 = scalar_lea.hbm %s1066_s2, 2048 }
 0x153   : > { %p755_p7 = scmp.ne.s32.totalorder %s1002_s24, %s754_s3  ;;  %p759_p9 = scmp.lt.s32.totalorder %s1002_s24, %s1066_s2 }
 0x154   : > { %p760_p11 = scmp.lt.s32.totalorder %s758_s27, %s754_s3 }
 0x155   : > { %p756_p4 = pnand %p755_p7, %p938_p13 }
 0x156   : > { %p761_p12 = por %p760_p11, %p759_p9 }
 0x157   : > { %p757_p6 = pneg %p756_p4 }
 0x159   : > { %p762_p1 = pnand %p761_p12, %p757_p6 }
 0x15b   : > { %765 = shalt.err (!%p762_p1)
}
 0x15c   : > { %s831_s17 = smov 128   ;;  %s832_s19 = smov 8  }
 0x15d   : > { %605 = dma.vmem_to_hbm [thread:$0]  (%p938_p13), %s1004_s28, 1024, %s1002_s24, %s427_s26, %s831_s17, %s831_s17, %s832_s19  }
 0x15e PF: > { %s456_s21 = sand.u32 1, %s804_s9   ;;  %p1080_p8 = scmp.ne.s32.totalorder %s1072_s20, 0 }
 0x15f   : > { %p1081_p10 = scmp.ge.s32.totalorder %s824_s14, 2  ;;  %s457_s12 = scalar_lea.sflag [#allocation4], %s456_s21 }
 0x161   : > { %p616_p0 = pnand %p1081_p10, %p1080_p8 }
 0x163   : > { %p617_p2 = pneg %p616_p0 }
 0x165   : > { %799 = dma.done.wait (%p617_p2), %s457_s12, 1024  }
 0x166   : > { %801 = vsyncadd (%p617_p2), %s457_s12, 4294966272  ;;  %s19_s14 = sadd.s32 1, %s824_s14   ;;  %s1082_s9 = smov %s808_s10 }
 0x167   : > { %p16_p3 = scmp.ge.s32.totalorder %s19_s14, 4   ;;  %s1083_s10 = smov %s812_s11 }
 0x168   : > { %s1084_s11 = smov %s947_s15  ;;  %s1085_s12 = smov %s820_s13 }
 0x169   : > { %s1086_s13 = smov %s1088_s25  ;;  %18 = sbr.rel (!%p16_p3) target bundleno = 7 (0x7), region = 78 }
 0x16e   :  { %462 = vsyncpa [#allocation3], 1 }
 0x16f   :  { %464 = vsyncpa [#allocation3 + $0x1], 1 }
 0x170   :  { %465 = vsyncpa [#allocation6], 1 }
 0x171   :  { %466 = vsyncpa [#allocation4], 1 }
 0x172   :  { %468 = vsyncpa [#allocation4 + $0x1], 1 }

</bundles_post_ra>
